<compile_context>
chip_gen: v5e
topology: v5e:2x2
jax: 0.10.0
libtpu: 0.0.40
codegen_flags: <defaults>
</compile_context>

<pallas_src>
import functools

import jax
import jax.numpy as jnp
from jax.experimental import pallas as pl
from jax.experimental.pallas import tpu as pltpu


# ----------------------------------------------------------------------------
# Fused kernel: select x2 -> 1x1 conv(+BN)+ReLU -> 3x3 depthwise(+BN)
#               -> 1x1 conv(+BN)+ReLU scattered into shuffled channels
#               -> identity branch copied into even channels.
# All operands are full blocks; single invocation (no grid).
# ----------------------------------------------------------------------------
def _residual_kernel(x_ref, w1_ref, mtap_ref, w3_ref, b1_ref, b2_ref, b3_ref,
                     o_ref, *, B, Cin, W):
    C = Cin // 2
    HW = x_ref.shape[1]
    x = x_ref[...]                                            # (B*Cin, HW) f32

    # --- stage A: channel-half select + 1x1 conv (+BN1 scale) + shift + ReLU
    #     One (B*C, B*Cin) @ (B*Cin, HW) MXU dot; full 8-sublane result.
    y = jnp.dot(w1_ref[...], x, preferred_element_type=jnp.float32)   # (B*C, HW)
    y = jnp.maximum(y + b1_ref[...], 0.0)

    # --- stage B: 3x3 depthwise conv, stride 1, pad 1 (BN2 scale folded).
    #     Masked per-tap planes are precomputed: each tap = roll + one FMA.
    z = y * mtap_ref[4]                                        # centre tap
    for dh in (-1, 0, 1):
        for dw in (-1, 0, 1):
            s = dh * W + dw
            if s == 0:
                continue
            idx = (dh + 1) * 3 + (dw + 1)
            z = z + pltpu.roll(y, shift=(-s) % HW, axis=1) * mtap_ref[idx]
    z = z + b2_ref[...]

    # --- stage C: 1x1 conv (+BN3) + ReLU, rows pre-scattered into the
    #     channel_shuffle interleave positions (odd output rows; even rows 0).
    o = jnp.dot(w3_ref[...], z, preferred_element_type=jnp.float32)   # (B*Cin, HW)
    o_ref[...] = jnp.maximum(o + b3_ref[...], 0.0).astype(o_ref.dtype)

    # --- identity branch: copy x1 channels into the even output rows (exact).
    for b in range(B):
        for j in range(C):
            src = b * Cin + j
            dst = b * Cin + 2 * j
            o_ref[dst:dst + 1, :] = x_ref[src:src + 1, :]


# ----------------------------------------------------------------------------
# Wrapper-side operand packing (done once; BN stats already folded in params)
# ----------------------------------------------------------------------------
def pack_operands(params, B, Cin, H, W):
    w1f, kf, w3f, b1, b2, b3 = params          # w1f,w3f: (C,C); kf: (C,9); b*: (C,1)
    C = Cin // 2
    HW = H * W
    eye_b = jnp.eye(B, dtype=jnp.float32)

    # Stage A: per-image [0 | w1f] so the dot both selects the upper channel
    # half and applies the 1x1 conv; block-diagonal over the batch.
    m1 = jnp.zeros((C, Cin), jnp.float32).at[:, C:].set(w1f)
    w1s = jnp.kron(eye_b, m1)                                   # (B*C, B*Cin)

    # Stage C: per-image 1x1 conv scattered into interleaved (odd) output rows.
    m3 = jnp.zeros((Cin, C), jnp.float32).at[1::2, :].set(w3f)
    w3s = jnp.kron(eye_b, m3)                                   # (B*Cin, B*C)

    b1t = jnp.tile(b1.reshape(C), B).reshape(B * C, 1)
    b2t = jnp.tile(b2.reshape(C), B).reshape(B * C, 1)
    v3 = jnp.zeros((Cin,), jnp.float32).at[1::2].set(b3.reshape(C))
    b3t = jnp.tile(v3, B).reshape(B * Cin, 1)

    # Depthwise: 9 masked tap planes (zero-pad boundary mask * per-channel tap).
    lane = jnp.arange(HW, dtype=jnp.int32)
    col = lane % W
    row = lane // W
    planes = []
    for dh in (-1, 0, 1):
        for dw in (-1, 0, 1):
            t = (dh + 1) * 3 + (dw + 1)
            valid = ((col + dw >= 0) & (col + dw < W) &
                     (row + dh >= 0) & (row + dh < H)).astype(jnp.float32)
            tap = jnp.tile(kf[:, t], B)                         # (B*C,)
            planes.append(tap[:, None] * valid[None, :])        # (B*C, HW)
    mtaps = jnp.stack(planes, axis=0)                           # (9, B*C, HW)

    return w1s, mtaps, w3s, b1t, b2t, b3t


def residual_forward(x_nchw, packed):
    """benchmodel=1, stride=1 forward (NCHW in / NCHW out)."""
    B, Cin, H, W = x_nchw.shape
    HW = H * W
    w1s, mtaps, w3s, b1t, b2t, b3t = packed
    x_flat = x_nchw.reshape(B * Cin, HW)        # pure reshape, no copy

    kernel = functools.partial(_residual_kernel, B=B, Cin=Cin, W=W)
    vmem = pl.BlockSpec(memory_space=pltpu.MemorySpace.VMEM)
    out_flat = pl.pallas_call(
        kernel,
        out_shape=jax.ShapeDtypeStruct((B * Cin, HW), x_nchw.dtype),
        in_specs=[vmem] * 7,
        out_specs=vmem,
    )(x_flat, w1s, mtaps, w3s, b1t, b2t, b3t)
    return out_flat.reshape(B, Cin, H, W)


# ----------------------------------------------------------------------------
# Pure-JAX reference (literal concat + channel_shuffle formulation)
# ----------------------------------------------------------------------------
def channel_shuffle_ref(x, groups):
    B, C, H, W = x.shape
    x = x.reshape(B, groups, C // groups, H, W)
    x = jnp.transpose(x, (0, 2, 1, 3, 4))
    return x.reshape(B, C, H, W)


def branch2_ref(x2, params):
    w1, k9, w3, b1, b2, b3 = params
    B, C, H, W = x2.shape
    y = jnp.einsum('oc,bchw->bohw', w1, x2) + b1.reshape(1, C, 1, 1)
    y = jnp.maximum(y, 0.0)
    yp = jnp.pad(y, ((0, 0), (0, 0), (1, 1), (1, 1)))
    k = k9.reshape(C, 3, 3)
    z = jnp.zeros_like(y)
    for kh in range(3):
        for kw in range(3):
            z = z + yp[:, :, kh:kh + H, kw:kw + W] * k[:, kh, kw].reshape(1, C, 1, 1)
    z = z + b2.reshape(1, C, 1, 1)
    o = jnp.einsum('oc,bchw->bohw', w3, z) + b3.reshape(1, C, 1, 1)
    return jnp.maximum(o, 0.0)


def residual_forward_ref(x_nchw, params):
    c_half = x_nchw.shape[1] // 2
    x1 = x_nchw[:, :c_half]
    x2 = x_nchw[:, c_half:]
    out2 = branch2_ref(x2, params)
    return channel_shuffle_ref(jnp.concatenate([x1, out2], axis=1), 2)


# ----------------------------------------------------------------------------
# Deterministic parameter construction (BN inference stats folded into weights)
# ----------------------------------------------------------------------------
def make_params(key, c, eps=1e-5):
    ks = jax.random.split(key, 15)

    def bn(kg, kb, km, kv):
        gamma = 1.0 + 0.1 * jax.random.normal(kg, (c,), jnp.float32)
        beta = 0.1 * jax.random.normal(kb, (c,), jnp.float32)
        mean = 0.1 * jax.random.normal(km, (c,), jnp.float32)
        var = jnp.abs(1.0 + 0.1 * jax.random.normal(kv, (c,), jnp.float32))
        scale = gamma / jnp.sqrt(var + eps)
        shift = beta - mean * scale
        return scale, shift

    # 1x1 conv weights stored as (Cout, Cin); torch layout (Cout, Cin, 1, 1)
    w1 = 0.2 * jax.random.normal(ks[0], (c, c), jnp.float32)
    w3 = 0.2 * jax.random.normal(ks[1], (c, c), jnp.float32)
    # depthwise 3x3 kernel stored as (C, kh, kw); torch layout (C, 1, 3, 3)
    kdw = 0.2 * jax.random.normal(ks[2], (c, 3, 3), jnp.float32)
    s1, t1 = bn(ks[3], ks[4], ks[5], ks[6])
    s2, t2 = bn(ks[7], ks[8], ks[9], ks[10])
    s3, t3 = bn(ks[11], ks[12], ks[13], ks[14])

    # fold BN scales into the conv weights (inference mode)
    w1f = w1 * s1[:, None]
    kf = (kdw * s2[:, None, None]).reshape(c, 9)
    w3f = w3 * s3[:, None]
    return (w1f, kf, w3f, t1.reshape(c, 1), t2.reshape(c, 1), t3.reshape(c, 1))


if __name__ == "__main__":
    # Residual(inp=8, oup=8, stride=1, benchmodel=1); input (B, C, H, W)
    B, C, H, W = 2, 8, 16, 16
    oup_inc = C // 2

    key = jax.random.PRNGKey(0)
    kx, kp = jax.random.split(key)
    x = jax.random.normal(kx, (B, C, H, W), jnp.float32)
    params = make_params(kp, oup_inc)
    packed = pack_operands(params, B, C, H, W)

    out = jax.jit(residual_forward)(x, packed)
    out = jax.block_until_ready(out)

    ref = residual_forward_ref(x, params)
    assert out.shape == (B, C, H, W)
    assert jnp.allclose(out, ref, atol=1e-4, rtol=1e-4), "mismatch vs reference"

    print("KERNEL_OK")
</pallas_src>

<mosaic_0001>
module attributes {stable_mosaic.version = 11 : i64} {
  func.func @_residual_kernel(%arg0: memref<16x256xf32, #tpu.memory_space<vmem>>, %arg1: memref<8x16xf32, #tpu.memory_space<vmem>>, %arg2: memref<9x8x256xf32, #tpu.memory_space<vmem>>, %arg3: memref<16x8xf32, #tpu.memory_space<vmem>>, %arg4: memref<8x1xf32, #tpu.memory_space<vmem>>, %arg5: memref<8x1xf32, #tpu.memory_space<vmem>>, %arg6: memref<16x1xf32, #tpu.memory_space<vmem>>, %arg7: memref<16x256xf32, #tpu.memory_space<vmem>>) attributes {dimension_semantics = [], scalar_prefetch = 0 : i64, scratch_operands = 0 : i64, tpu.core_type = #tpu.core_type<tc>} {
    %c0 = arith.constant 0 : index
    %c0_0 = arith.constant 0 : index
    %0 = vector.load %arg0[%c0, %c0_0] : memref<16x256xf32, #tpu.memory_space<vmem>>, vector<16x256xf32>
    %c0_1 = arith.constant 0 : index
    %c0_2 = arith.constant 0 : index
    %1 = vector.load %arg1[%c0_1, %c0_2] : memref<8x16xf32, #tpu.memory_space<vmem>>, vector<8x16xf32>
    %cst = arith.constant dense<0.000000e+00> : vector<8x256xf32>
    %2 = tpu.matmul %1, %0, %cst {dimension_numbers = #tpu.dot_dimension_numbers<[1], [0], [0], [1], [0, 0, 1, 1], [], []>} : vector<8x16xf32>, vector<16x256xf32>, vector<8x256xf32> -> vector<8x256xf32>
    %c0_3 = arith.constant 0 : index
    %c0_4 = arith.constant 0 : index
    %3 = vector.load %arg4[%c0_3, %c0_4] : memref<8x1xf32, #tpu.memory_space<vmem>>, vector<8x1xf32>
    %4 = vector.broadcast %3 : vector<8x1xf32> to vector<8x256xf32>
    %5 = arith.addf %2, %4 : vector<8x256xf32>
    %cst_5 = arith.constant 0.000000e+00 : f32
    %6 = vector.broadcast %cst_5 : f32 to vector<8x256xf32>
    %7 = arith.maximumf %5, %6 : vector<8x256xf32>
    %c4 = arith.constant 4 : index
    %c0_6 = arith.constant 0 : index
    %c0_7 = arith.constant 0 : index
    %8 = vector.load %arg2[%c4, %c0_6, %c0_7] : memref<9x8x256xf32, #tpu.memory_space<vmem>>, vector<1x8x256xf32>
    %9 = vector.shape_cast %8 : vector<1x8x256xf32> to vector<8x256xf32>
    %10 = arith.mulf %7, %9 : vector<8x256xf32>
    %c17_i32 = arith.constant 17 : i32
    %11 = tpu.dynamic_rotate %7 by %c17_i32 dim 1 : vector<8x256xf32>, i32 -> vector<8x256xf32>
    %c0_8 = arith.constant 0 : index
    %c0_9 = arith.constant 0 : index
    %c0_10 = arith.constant 0 : index
    %12 = vector.load %arg2[%c0_8, %c0_9, %c0_10] : memref<9x8x256xf32, #tpu.memory_space<vmem>>, vector<1x8x256xf32>
    %13 = vector.shape_cast %12 : vector<1x8x256xf32> to vector<8x256xf32>
    %14 = arith.mulf %11, %13 : vector<8x256xf32>
    %15 = arith.addf %10, %14 : vector<8x256xf32>
    %c16_i32 = arith.constant 16 : i32
    %16 = tpu.dynamic_rotate %7 by %c16_i32 dim 1 : vector<8x256xf32>, i32 -> vector<8x256xf32>
    %c1 = arith.constant 1 : index
    %c0_11 = arith.constant 0 : index
    %c0_12 = arith.constant 0 : index
    %17 = vector.load %arg2[%c1, %c0_11, %c0_12] : memref<9x8x256xf32, #tpu.memory_space<vmem>>, vector<1x8x256xf32>
    %18 = vector.shape_cast %17 : vector<1x8x256xf32> to vector<8x256xf32>
    %19 = arith.mulf %16, %18 : vector<8x256xf32>
    %20 = arith.addf %15, %19 : vector<8x256xf32>
    %c15_i32 = arith.constant 15 : i32
    %21 = tpu.dynamic_rotate %7 by %c15_i32 dim 1 : vector<8x256xf32>, i32 -> vector<8x256xf32>
    %c2 = arith.constant 2 : index
    %c0_13 = arith.constant 0 : index
    %c0_14 = arith.constant 0 : index
    %22 = vector.load %arg2[%c2, %c0_13, %c0_14] : memref<9x8x256xf32, #tpu.memory_space<vmem>>, vector<1x8x256xf32>
    %23 = vector.shape_cast %22 : vector<1x8x256xf32> to vector<8x256xf32>
    %24 = arith.mulf %21, %23 : vector<8x256xf32>
    %25 = arith.addf %20, %24 : vector<8x256xf32>
    %c1_i32 = arith.constant 1 : i32
    %26 = tpu.dynamic_rotate %7 by %c1_i32 dim 1 : vector<8x256xf32>, i32 -> vector<8x256xf32>
    %c3 = arith.constant 3 : index
    %c0_15 = arith.constant 0 : index
    %c0_16 = arith.constant 0 : index
    %27 = vector.load %arg2[%c3, %c0_15, %c0_16] : memref<9x8x256xf32, #tpu.memory_space<vmem>>, vector<1x8x256xf32>
    %28 = vector.shape_cast %27 : vector<1x8x256xf32> to vector<8x256xf32>
    %29 = arith.mulf %26, %28 : vector<8x256xf32>
    %30 = arith.addf %25, %29 : vector<8x256xf32>
    %c255_i32 = arith.constant 255 : i32
    %31 = tpu.dynamic_rotate %7 by %c255_i32 dim 1 : vector<8x256xf32>, i32 -> vector<8x256xf32>
    %c5 = arith.constant 5 : index
    %c0_17 = arith.constant 0 : index
    %c0_18 = arith.constant 0 : index
    %32 = vector.load %arg2[%c5, %c0_17, %c0_18] : memref<9x8x256xf32, #tpu.memory_space<vmem>>, vector<1x8x256xf32>
    %33 = vector.shape_cast %32 : vector<1x8x256xf32> to vector<8x256xf32>
    %34 = arith.mulf %31, %33 : vector<8x256xf32>
    %35 = arith.addf %30, %34 : vector<8x256xf32>
    %c241_i32 = arith.constant 241 : i32
    %36 = tpu.dynamic_rotate %7 by %c241_i32 dim 1 : vector<8x256xf32>, i32 -> vector<8x256xf32>
    %c6 = arith.constant 6 : index
    %c0_19 = arith.constant 0 : index
    %c0_20 = arith.constant 0 : index
    %37 = vector.load %arg2[%c6, %c0_19, %c0_20] : memref<9x8x256xf32, #tpu.memory_space<vmem>>, vector<1x8x256xf32>
    %38 = vector.shape_cast %37 : vector<1x8x256xf32> to vector<8x256xf32>
    %39 = arith.mulf %36, %38 : vector<8x256xf32>
    %40 = arith.addf %35, %39 : vector<8x256xf32>
    %c240_i32 = arith.constant 240 : i32
    %41 = tpu.dynamic_rotate %7 by %c240_i32 dim 1 : vector<8x256xf32>, i32 -> vector<8x256xf32>
    %c7 = arith.constant 7 : index
    %c0_21 = arith.constant 0 : index
    %c0_22 = arith.constant 0 : index
    %42 = vector.load %arg2[%c7, %c0_21, %c0_22] : memref<9x8x256xf32, #tpu.memory_space<vmem>>, vector<1x8x256xf32>
    %43 = vector.shape_cast %42 : vector<1x8x256xf32> to vector<8x256xf32>
    %44 = arith.mulf %41, %43 : vector<8x256xf32>
    %45 = arith.addf %40, %44 : vector<8x256xf32>
    %c239_i32 = arith.constant 239 : i32
    %46 = tpu.dynamic_rotate %7 by %c239_i32 dim 1 : vector<8x256xf32>, i32 -> vector<8x256xf32>
    %c8 = arith.constant 8 : index
    %c0_23 = arith.constant 0 : index
    %c0_24 = arith.constant 0 : index
    %47 = vector.load %arg2[%c8, %c0_23, %c0_24] : memref<9x8x256xf32, #tpu.memory_space<vmem>>, vector<1x8x256xf32>
    %48 = vector.shape_cast %47 : vector<1x8x256xf32> to vector<8x256xf32>
    %49 = arith.mulf %46, %48 : vector<8x256xf32>
    %50 = arith.addf %45, %49 : vector<8x256xf32>
    %c0_25 = arith.constant 0 : index
    %c0_26 = arith.constant 0 : index
    %51 = vector.load %arg5[%c0_25, %c0_26] : memref<8x1xf32, #tpu.memory_space<vmem>>, vector<8x1xf32>
    %52 = vector.broadcast %51 : vector<8x1xf32> to vector<8x256xf32>
    %53 = arith.addf %50, %52 : vector<8x256xf32>
    %c0_27 = arith.constant 0 : index
    %c0_28 = arith.constant 0 : index
    %54 = vector.load %arg3[%c0_27, %c0_28] : memref<16x8xf32, #tpu.memory_space<vmem>>, vector<16x8xf32>
    %cst_29 = arith.constant dense<0.000000e+00> : vector<16x256xf32>
    %55 = tpu.matmul %54, %53, %cst_29 {dimension_numbers = #tpu.dot_dimension_numbers<[1], [0], [0], [1], [0, 0, 1, 1], [], []>} : vector<16x8xf32>, vector<8x256xf32>, vector<16x256xf32> -> vector<16x256xf32>
    %c0_30 = arith.constant 0 : index
    %c0_31 = arith.constant 0 : index
    %56 = vector.load %arg6[%c0_30, %c0_31] : memref<16x1xf32, #tpu.memory_space<vmem>>, vector<16x1xf32>
    %57 = vector.broadcast %56 : vector<16x1xf32> to vector<16x256xf32>
    %58 = arith.addf %55, %57 : vector<16x256xf32>
    %cst_32 = arith.constant 0.000000e+00 : f32
    %59 = vector.broadcast %cst_32 : f32 to vector<16x256xf32>
    %60 = arith.maximumf %58, %59 : vector<16x256xf32>
    %c0_33 = arith.constant 0 : index
    %c0_34 = arith.constant 0 : index
    %61 = vector.load %arg7[%c0_33, %c0_34] : memref<16x256xf32, #tpu.memory_space<vmem>>, vector<16x256xf32>
    tpu.vector_store %arg7[%c0_33, %c0_34], %60 {strides = array<i32>} : memref<16x256xf32, #tpu.memory_space<vmem>>, vector<16x256xf32>,
    %c0_35 = arith.constant 0 : index
    %c0_36 = arith.constant 0 : index
    %62 = vector.load %arg0[%c0_35, %c0_36] : memref<16x256xf32, #tpu.memory_space<vmem>>, vector<1x256xf32>
    %c0_37 = arith.constant 0 : index
    %c0_38 = arith.constant 0 : index
    %63 = vector.load %arg7[%c0_37, %c0_38] : memref<16x256xf32, #tpu.memory_space<vmem>>, vector<1x256xf32>
    tpu.vector_store %arg7[%c0_37, %c0_38], %62 {strides = array<i32>} : memref<16x256xf32, #tpu.memory_space<vmem>>, vector<1x256xf32>,
    %c1_39 = arith.constant 1 : index
    %c0_40 = arith.constant 0 : index
    %64 = vector.load %arg0[%c1_39, %c0_40] : memref<16x256xf32, #tpu.memory_space<vmem>>, vector<1x256xf32>
    %c2_41 = arith.constant 2 : index
    %c0_42 = arith.constant 0 : index
    %65 = vector.load %arg7[%c2_41, %c0_42] : memref<16x256xf32, #tpu.memory_space<vmem>>, vector<1x256xf32>
    tpu.vector_store %arg7[%c2_41, %c0_42], %64 {strides = array<i32>} : memref<16x256xf32, #tpu.memory_space<vmem>>, vector<1x256xf32>,
    %c2_43 = arith.constant 2 : index
    %c0_44 = arith.constant 0 : index
    %66 = vector.load %arg0[%c2_43, %c0_44] : memref<16x256xf32, #tpu.memory_space<vmem>>, vector<1x256xf32>
    %c4_45 = arith.constant 4 : index
    %c0_46 = arith.constant 0 : index
    %67 = vector.load %arg7[%c4_45, %c0_46] : memref<16x256xf32, #tpu.memory_space<vmem>>, vector<1x256xf32>
    tpu.vector_store %arg7[%c4_45, %c0_46], %66 {strides = array<i32>} : memref<16x256xf32, #tpu.memory_space<vmem>>, vector<1x256xf32>,
    %c3_47 = arith.constant 3 : index
    %c0_48 = arith.constant 0 : index
    %68 = vector.load %arg0[%c3_47, %c0_48] : memref<16x256xf32, #tpu.memory_space<vmem>>, vector<1x256xf32>
    %c6_49 = arith.constant 6 : index
    %c0_50 = arith.constant 0 : index
    %69 = vector.load %arg7[%c6_49, %c0_50] : memref<16x256xf32, #tpu.memory_space<vmem>>, vector<1x256xf32>
    tpu.vector_store %arg7[%c6_49, %c0_50], %68 {strides = array<i32>} : memref<16x256xf32, #tpu.memory_space<vmem>>, vector<1x256xf32>,
    %c8_51 = arith.constant 8 : index
    %c0_52 = arith.constant 0 : index
    %70 = vector.load %arg0[%c8_51, %c0_52] : memref<16x256xf32, #tpu.memory_space<vmem>>, vector<1x256xf32>
    %c8_53 = arith.constant 8 : index
    %c0_54 = arith.constant 0 : index
    %71 = vector.load %arg7[%c8_53, %c0_54] : memref<16x256xf32, #tpu.memory_space<vmem>>, vector<1x256xf32>
    tpu.vector_store %arg7[%c8_53, %c0_54], %70 {strides = array<i32>} : memref<16x256xf32, #tpu.memory_space<vmem>>, vector<1x256xf32>,
    %c9 = arith.constant 9 : index
    %c0_55 = arith.constant 0 : index
    %72 = vector.load %arg0[%c9, %c0_55] : memref<16x256xf32, #tpu.memory_space<vmem>>, vector<1x256xf32>
    %c10 = arith.constant 10 : index
    %c0_56 = arith.constant 0 : index
    %73 = vector.load %arg7[%c10, %c0_56] : memref<16x256xf32, #tpu.memory_space<vmem>>, vector<1x256xf32>
    tpu.vector_store %arg7[%c10, %c0_56], %72 {strides = array<i32>} : memref<16x256xf32, #tpu.memory_space<vmem>>, vector<1x256xf32>,
    %c10_57 = arith.constant 10 : index
    %c0_58 = arith.constant 0 : index
    %74 = vector.load %arg0[%c10_57, %c0_58] : memref<16x256xf32, #tpu.memory_space<vmem>>, vector<1x256xf32>
    %c12 = arith.constant 12 : index
    %c0_59 = arith.constant 0 : index
    %75 = vector.load %arg7[%c12, %c0_59] : memref<16x256xf32, #tpu.memory_space<vmem>>, vector<1x256xf32>
    tpu.vector_store %arg7[%c12, %c0_59], %74 {strides = array<i32>} : memref<16x256xf32, #tpu.memory_space<vmem>>, vector<1x256xf32>,
    %c11 = arith.constant 11 : index
    %c0_60 = arith.constant 0 : index
    %76 = vector.load %arg0[%c11, %c0_60] : memref<16x256xf32, #tpu.memory_space<vmem>>, vector<1x256xf32>
    %c14 = arith.constant 14 : index
    %c0_61 = arith.constant 0 : index
    %77 = vector.load %arg7[%c14, %c0_61] : memref<16x256xf32, #tpu.memory_space<vmem>>, vector<1x256xf32>
    tpu.vector_store %arg7[%c14, %c0_61], %76 {strides = array<i32>} : memref<16x256xf32, #tpu.memory_space<vmem>>, vector<1x256xf32>,
    return
  }
}

</mosaic_0001>

<bundles_post_ra>
// kernel: residual_forward.1
= control target key start
LH: loop header
LB: loop body
LE: loop exit
PB: predicated region body
PF: predicated region fallthrough
CT: control target
= control target key end

     0   :  { %v378_v3 = vmov 0   ;;  %vm37_vm0 = vcmask 130048   ;;  %s379_s13 = smov 16   ;;  %s381_s14 = smov 15   ;;  %v92_v20 = vlaneseq  ;;  %vm223_vm9 = vcmask 64512   ;;  %s610_s0 = inlined_call_operand.vmem [shape: f32[16,256], index: 0, kind: input, shape index: {}]   ;;  %s611_s1 = inlined_call_operand.vmem [shape: f32[8,16], index: 1, kind: input, shape index: {}]   ;;  %s612_s4 = inlined_call_operand.vmem [shape: f32[8,1], index: 4, kind: input, shape index: {}]   ;;  %s613_s5 = inlined_call_operand.vmem [shape: f32[8,1], index: 5, kind: input, shape index: {}]   ;;  %s614_s6 = inlined_call_operand.vmem [shape: f32[16,1], index: 6, kind: input, shape index: {}]   ;;  %s615_s2 = inlined_call_operand.vmem [shape: f32[9,8,256], index: 2, kind: input, shape index: {}]   ;;  %s616_s3 = inlined_call_operand.vmem [shape: f32[16,8], index: 3, kind: input, shape index: {}]   ;;  %s617_s7 = inlined_call_operand.vmem [shape: f32[16,256], index: 7, kind: output, shape index: {}]  }
   0x1   :  { %v28_v0 = vld [vmem:[%s610_s0 + $0x10] sm:$0xff]  ;;  %v29_v1 = vld [vmem:[%s610_s0 + $0x18] sm:$0xff]  ;;  %v26_v2 = vld [vmem:[%s610_s0] sm:$0xff]  ;;  %375 = vset.pattern.permute.xlu0 %v378_v3  ;;  %376 = vset.pattern.permute.xlu2 %v378_v3  ;;  %s383_s15 = smov 127   ;;  %s384_s16 = smov 113  }
   0x2   :  { %55 = vmatpush.msra.mxu0 %v28_v0  ;;  %75 = vmatpush.msra.mxu1 %v29_v1  ;;  %v27_v4 = vld [vmem:[%s610_s0 + $0x8] sm:$0xff]  ;;  %v30_v5 = vld [vmem:[%s611_s1] sm:$0xff]  ;;  %s380_s1 = smov 17   ;;  %s385_s17 = smov 112   ;;  %v452_v23 = vand.u32 127, %v92_v20  ;;  %v334_v33 = vld [vmem:[%s615_s2 + $0x10] sm:$0xff] }
   0x3   :  { %v31_v6 = vld [vmem:[%s612_s4] sm:$0xff]  ;;  %377 = vset.pattern.permute.xlu1 %v378_v3  ;;  %s382_s4 = smov 1   ;;  %s386_s18 = smov 111   ;;  %v98_v27 = vld [vmem:[%s615_s2 + $0x8] sm:$0xff]  ;;  %v335_v34 = vld [vmem:[%s615_s2 + $0x18] sm:$0xff]  ;;  %vm533_vm10 = vcmp.lt.s32.totalorder %v92_v20, 256 }
   0x4   :  { %34 = vperm.xlu0 %375, %v31_v6   ;;  %56 = vmatpush.msra.mxu0 %v26_v2  ;;  %v201_v14 = vld [vmem:[%s613_s5] sm:$0xff]  ;;  %vm94_vm1 = vcmp.lt.s32.totalorder %v452_v23, 17  ;;  %vm107_vm2 = vcmp.lt.s32.totalorder %v452_v23, 16  ;;  %v333_v31 = vld [vmem:[%s615_s2 + $0x48] sm:$0xff]  ;;  %vm121_vm3 = vcmp.lt.s32.totalorder %v452_v23, 15  ;;  %vm135_vm4 = vcmp.lt.s32.totalorder %v452_v23, 1 }
   0x5   :  { %76 = vmatpush.msra.mxu1 %v27_v4  ;;  %330 = vmatmul.msk.f32.vlgmr.msra.gmra.mxu0 %vm37_vm0, %v30_v5  ;;  %v211_v15 = vld [vmem:[%s614_s6] sm:$0xff]  ;;  %v212_v45 = vld [vmem:[%s614_s6 + $0x8] sm:$0xff]  ;;  %vm149_vm5 = vcmp.lt.s32.totalorder %v452_v23, 127  ;;  %v338_v52 = vld [vmem:[%s615_s2 + $0x30] sm:$0xff]  ;;  %vm163_vm6 = vcmp.lt.s32.totalorder %v452_v23, 113  ;;  %vm177_vm7 = vcmp.lt.s32.totalorder %v452_v23, 112 }
   0x6   :  { %331 = vmatmul.msk.f32.vlgmr.msra.gmra.mxu1 %vm37_vm0, %v30_v5  ;;  %v97_v26 = vld [vmem:[%s615_s2] sm:$0xff]  ;;  %v337_v49 = vld [vmem:[%s615_s2 + $0x28] sm:$0xff]  ;;  %v339_v53 = vld [vmem:[%s615_s2 + $0x38] sm:$0xff]  ;;  %vm191_vm8 = vcmp.lt.s32.totalorder %v452_v23, 111 }
   0x7   :  { %v332_v30 = vld [vmem:[%s615_s2 + $0x40] sm:$0xff]  ;;  %v340_v58 = vld [vmem:[%s615_s2 + $0x50] sm:$0xff]  ;;  %v341_v59 = vld [vmem:[%s615_s2 + $0x58] sm:$0xff] }
   0x8   :  { %v336_v48 = vld [vmem:[%s615_s2 + $0x20] sm:$0xff] }
  0x76   :  { %v35_v7 = vpop.permute.xlu0 %34 }
  0x82   :  { %v58_v8 = vpop.f32.mrf.mxu0 }
  0x83   :  { %v78_v9 = vpop.f32.mrf.mxu1  ;;  %v59_v10 = vadd.f32 %v58_v8, %v35_v7 }
  0x84   :  { %v79_v11 = vadd.f32 %v78_v9, %v35_v7 }
  0x85   :  { %v81_v12 = vmax.f32 %v59_v10, 0.0 }
  0x86   :  { %v82_v13 = vmax.f32 %v79_v11, 0.0  ;;  %v342_v11 = vld [vmem:[%s615_s2 + $0x60] sm:$0xff] }
  0x87   :  { %88 = vrot.lane.b32.xlu0 %v81_v12, %s380_s1  ;;  %v86_v40 = vmul.f32 %v332_v30, %v81_v12 }
  0x88   :  { %105 = vrot.lane.b32.xlu2 %v82_v13, %s379_s13  ;;  %90 = vrot.lane.b32.xlu1 %v82_v13, %s380_s1  ;;  %v87_v39 = vmul.f32 %v333_v31, %v82_v13 }
  0x8f   :  { %119 = vrot.lane.b32.xlu0 %v82_v13, %s381_s14 }
  0x90   :  { %117 = vrot.lane.b32.xlu2 %v81_v12, %s381_s14  ;;  %103 = vrot.lane.b32.xlu1 %v81_v12, %s379_s13 }
  0x97   :  { %145 = vrot.lane.b32.xlu0 %v81_v12, %s383_s15 }
  0x98   :  { %133 = vrot.lane.b32.xlu2 %v82_v13, %s382_s4  ;;  %131 = vrot.lane.b32.xlu1 %v81_v12, %s382_s4 }
  0x9f   :  { %161 = vrot.lane.b32.xlu0 %v82_v13, %s384_s16 }
  0xa0   :  { %159 = vrot.lane.b32.xlu2 %v81_v12, %s384_s16  ;;  %147 = vrot.lane.b32.xlu1 %v82_v13, %s383_s15 }
  0xa7   :  { %187 = vrot.lane.b32.xlu0 %v81_v12, %s386_s18 }
  0xa8   :  { %175 = vrot.lane.b32.xlu2 %v82_v13, %s385_s17  ;;  %173 = vrot.lane.b32.xlu1 %v81_v12, %s385_s17  ;;  %v343_v12 = vld [vmem:[%s615_s2 + $0x68] sm:$0xff] }
  0xaf   :  { %215 = vperm.xlu0 %375, %v211_v15   ;;  %v344_v15 = vld [vmem:[%s615_s2 + $0x70] sm:$0xff] }
  0xb0   :  { %189 = vrot.lane.b32.xlu1 %v82_v13, %s386_s18  ;;  %204 = vperm.xlu2 %376, %v201_v14  }
  0xb8   :  { %220 = vperm.xlu1 %377, %v212_v45  }
  0xe2   :  { %v106_v16 = vpop.permute.xlu2 %105 }
  0xea   :  { %v118_v19 = vpop.permute.xlu2 %117 }
  0xf2   :  { %v134_v24 = vpop.permute.xlu2 %133 }
  0xf9   :  { %v89_v18 = vpop.permute.xlu0 %88 }
  0xfa   :  { %v91_v17 = vpop.permute.xlu1 %90  ;;  %v160_v41 = vpop.permute.xlu2 %159 }
  0xfb   :  { %v95_v28 = vsel %vm94_vm1, %v89_v18, %v91_v17  ;;  %v96_v29 = vsel %vm94_vm1, %v91_v17, %v89_v18 }
  0xfc   :  { %v99_v37 = vmul.f32 %v97_v26, %v96_v29  ;;  %v100_v38 = vmul.f32 %v98_v27, %v95_v28  ;;  %v346_v27 = vld [vmem:[%s615_s2 + $0x80] sm:$0xff]  ;;  %v347_v28 = vld [vmem:[%s615_s2 + $0x88] sm:$0xff] }
  0xfe   :  { %v101_v46 = vadd.f32 %v99_v37, %v86_v40  ;;  %v102_v47 = vadd.f32 %v100_v38, %v87_v39 }
 0x101   :  { %v120_v22 = vpop.permute.xlu0 %119 }
 0x102   :  { %v104_v21 = vpop.permute.xlu1 %103  ;;  %v122_v50 = vsel %vm121_vm3, %v118_v19, %v120_v22  ;;  %v123_v51 = vsel %vm121_vm3, %v120_v22, %v118_v19  ;;  %v176_v8 = vpop.permute.xlu2 %175 }
 0x103   :  { %v108_v35 = vsel %vm107_vm2, %v104_v21, %v106_v16  ;;  %v109_v36 = vsel %vm107_vm2, %v106_v16, %v104_v21  ;;  %v127_v62 = vmul.f32 %v336_v48, %v123_v51  ;;  %v128_v63 = vmul.f32 %v337_v49, %v122_v50  ;;  %v345_v16 = vld [vmem:[%s615_s2 + $0x78] sm:$0xff] }
 0x104   :  { %v113_v42 = vmul.f32 %v334_v33, %v109_v36  ;;  %v114_v43 = vmul.f32 %v335_v34, %v108_v35 }
 0x106   :  { %v115_v56 = vadd.f32 %v113_v42, %v101_v46  ;;  %v116_v57 = vadd.f32 %v114_v43, %v102_v47  ;;  %v209_v43 = vld [vmem:[%s616_s3] sm:$0xff] }
 0x108   :  { %v129_v3 = vadd.f32 %v127_v62, %v115_v56  ;;  %v130_v4 = vadd.f32 %v128_v63, %v116_v57  ;;  %v356_v56 = vld [vmem:[%s610_s0 + $0x3] ss:$8 sm:$0x3]  ;;  %v358_v63 = vld [vmem:[%s610_s0 + $0x10] ss:$8 sm:$0x3] }
 0x109   :  { %v146_v32 = vpop.permute.xlu0 %145 }
 0x10a   :  { %v132_v25 = vpop.permute.xlu1 %131  ;;  %v205_v38 = vpop.permute.xlu2 %204 }
 0x10b   :  { %v136_v54 = vsel %vm135_vm4, %v132_v25, %v134_v24  ;;  %v137_v55 = vsel %vm135_vm4, %v134_v24, %v132_v25 }
 0x10c   :  { %v141_v0 = vmul.f32 %v338_v52, %v137_v55  ;;  %v142_v1 = vmul.f32 %v339_v53, %v136_v54  ;;  %v284_v52 = vld [vmem:[%s610_s0] ss:$8 sm:$0x3]  ;;  %v352_v54 = vld [vmem:[%s610_s0 + $0x1] ss:$8 sm:$0x3] }
 0x10d   :  { %v354_v55 = vld [vmem:[%s610_s0 + $0x2] ss:$8 sm:$0x3] }
 0x10e   :  { %v143_v9 = vadd.f32 %v141_v0, %v129_v3  ;;  %v144_v10 = vadd.f32 %v142_v1, %v130_v4  ;;  %v360_v0 = vld [vmem:[%s610_s0 + $0x11] ss:$8 sm:$0x3]  ;;  %v362_v1 = vld [vmem:[%s610_s0 + $0x12] ss:$8 sm:$0x3] }
 0x111   :  { %v162_v2 = vpop.permute.xlu0 %161 }
 0x112   :  { %v148_v44 = vpop.permute.xlu1 %147  ;;  %v164_v13 = vsel %vm163_vm6, %v160_v41, %v162_v2  ;;  %v165_v14 = vsel %vm163_vm6, %v162_v2, %v160_v41  ;;  %v364_v2 = vld [vmem:[%s610_s0 + $0x13] ss:$8 sm:$0x3] }
 0x113   :  { %v150_v60 = vsel %vm149_vm5, %v146_v32, %v148_v44  ;;  %v151_v61 = vsel %vm149_vm5, %v148_v44, %v146_v32  ;;  %v169_v22 = vmul.f32 %v342_v11, %v164_v13  ;;  %v170_v24 = vmul.f32 %v343_v12, %v165_v14  ;;  %v210_v44 = vld [vmem:[%s616_s3 + $0x8] sm:$0xff] }
 0x114   :  { %v155_v5 = vmul.f32 %v340_v58, %v150_v60  ;;  %v156_v6 = vmul.f32 %v341_v59, %v151_v61 }
 0x116   :  { %v157_v19 = vadd.f32 %v155_v5, %v143_v9  ;;  %v158_v21 = vadd.f32 %v156_v6, %v144_v10 }
 0x118   :  { %v171_v29 = vadd.f32 %v169_v22, %v157_v19  ;;  %v172_v30 = vadd.f32 %v170_v24, %v158_v21 }
 0x119   :  { %v188_v31 = vpop.permute.xlu0 %187 }
 0x11a   :  { %v174_v7 = vpop.permute.xlu1 %173 }
 0x11b   :  { %v178_v17 = vsel %vm177_vm7, %v174_v7, %v176_v8  ;;  %v179_v18 = vsel %vm177_vm7, %v176_v8, %v174_v7 }
 0x11c   :  { %v183_v25 = vmul.f32 %v344_v15, %v178_v17  ;;  %v184_v26 = vmul.f32 %v345_v16, %v179_v18 }
 0x11e   :  { %v185_v36 = vadd.f32 %v183_v25, %v171_v29  ;;  %v186_v37 = vadd.f32 %v184_v26, %v172_v30 }
 0x121   :  { %v216_v45 = vpop.permute.xlu0 %215 }
 0x122   :  { %v190_v32 = vpop.permute.xlu1 %189 }
 0x123   :  { %v192_v33 = vsel %vm191_vm8, %v188_v31, %v190_v32  ;;  %v193_v34 = vsel %vm191_vm8, %v190_v32, %v188_v31 }
 0x124   :  { %v197_v35 = vmul.f32 %v346_v27, %v192_v33  ;;  %v198_v23 = vmul.f32 %v347_v28, %v193_v34 }
 0x126   :  { %v199_v39 = vadd.f32 %v197_v35, %v185_v36  ;;  %v200_v40 = vadd.f32 %v198_v23, %v186_v37 }
 0x128   :  { %v207_v41 = vadd.f32 %v205_v38, %v199_v39  ;;  %v208_v42 = vadd.f32 %v205_v38, %v200_v40 }
 0x12a   :  { %245 = vmatpush.msra.mxu2 %v207_v41  ;;  %268 = vmatpush.msra.mxu3 %v208_v42  ;;  %v221_v20 = vpop.permute.xlu1 %220 }
 0x12b   :  { %348 = vmatmul.msk.f32.vlgmr.msra.gmra.mxu2 %vm223_vm9, %v209_v43  ;;  %350 = vmatmul.msk.f32.vlgmr.msra.gmra.mxu3 %vm223_vm9, %v209_v43 }
 0x133   :  { %349 = vmatmul.msk.f32.gmra.mxu2 %vm223_vm9, %v210_v44  ;;  %351 = vmatmul.msk.f32.gmra.mxu3 %vm223_vm9, %v210_v44 }
 0x1ae   :  { %v247_v46 = vpop.f32.mrf.mxu2  ;;  %v270_v47 = vpop.f32.mrf.mxu3 }
 0x1af   :  { %v248_v48 = vadd.f32 %v247_v46, %v216_v45  ;;  %v271_v49 = vadd.f32 %v270_v47, %v216_v45 }
 0x1b1   :  { %v276_v50 = vmax.f32 %v248_v48, 0.0  ;;  %v277_v51 = vmax.f32 %v271_v49, 0.0 }
 0x1b3   :  { %280 = vst [vmem:[%s617_s7] sm:$0xff] %v276_v50 }
 0x1b4   :  { %281 = vst [vmem:[%s617_s7 + $0x8] sm:$0xff] %v277_v51 }
 0x1b5   :  { %289 = vst.msk [vmem:[%s617_s7] ss:$8 sm:$0x3] %vm533_vm10, %v284_v52 }
 0x1b6   :  { %353 = vst.msk [vmem:[%s617_s7 + $0x2] ss:$8 sm:$0x3] %vm533_vm10, %v352_v54  ;;  %v250_v57 = vpop.f32.mrf.mxu2  ;;  %v273_v58 = vpop.f32.mrf.mxu3 }
 0x1b7   :  { %355 = vst.msk [vmem:[%s617_s7 + $0x4] ss:$8 sm:$0x3] %vm533_vm10, %v354_v55  ;;  %v251_v59 = vadd.f32 %v250_v57, %v221_v20  ;;  %v274_v60 = vadd.f32 %v273_v58, %v221_v20 }
 0x1b8   :  { %357 = vst.msk [vmem:[%s617_s7 + $0x6] ss:$8 sm:$0x3] %vm533_vm10, %v356_v56 }
 0x1b9   :  { %v278_v61 = vmax.f32 %v251_v59, 0.0  ;;  %v279_v62 = vmax.f32 %v274_v60, 0.0 }
 0x1bb   :  { %282 = vst [vmem:[%s617_s7 + $0x10] sm:$0xff] %v278_v61 }
 0x1bc   :  { %283 = vst [vmem:[%s617_s7 + $0x18] sm:$0xff] %v279_v62 }
 0x1bd   :  { %359 = vst.msk [vmem:[%s617_s7 + $0x10] ss:$8 sm:$0x3] %vm533_vm10, %v358_v63 }
 0x1be   :  { %361 = vst.msk [vmem:[%s617_s7 + $0x12] ss:$8 sm:$0x3] %vm533_vm10, %v360_v0 }
 0x1bf   :  { %363 = vst.msk [vmem:[%s617_s7 + $0x14] ss:$8 sm:$0x3] %vm533_vm10, %v362_v1 }
 0x1c0   :  { %365 = vst.msk [vmem:[%s617_s7 + $0x16] ss:$8 sm:$0x3] %vm533_vm10, %v364_v2 }

</bundles_post_ra>
